<compile_context>
chip_gen: v6e
topology: v6e:2x2x1
jax: 0.10.0
libtpu: 0.0.40
codegen_flags: <defaults>
</compile_context>

<pallas_src>
import functools

import numpy as np
import jax
import jax.numpy as jnp
from jax.experimental import pallas as pl
from jax.experimental.pallas import tpu as pltpu


# ---------------------------------------------------------------------------
# Host-side construction of the (small, static) pooling / upsampling matrices
# ---------------------------------------------------------------------------
def adaptive_avg_pool_matrix(out_size, in_size):
    """Row r holds the averaging weights of AdaptiveAvgPool1d bin r."""
    m = np.zeros((out_size, in_size), dtype=np.float32)
    for i in range(out_size):
        start = (i * in_size) // out_size
        end = -(-((i + 1) * in_size) // out_size)  # ceil
        m[i, start:end] = 1.0 / float(end - start)
    return m


def bilinear_upsample_matrix(out_size, in_size):
    """Row r holds bilinear interp weights (align_corners=False, PyTorch)."""
    m = np.zeros((out_size, in_size), dtype=np.float32)
    if in_size == out_size:
        np.fill_diagonal(m, 1.0)
        return m
    scale = in_size / out_size
    for i in range(out_size):
        src = max((i + 0.5) * scale - 0.5, 0.0)
        x0 = min(int(np.floor(src)), in_size - 1)
        x1 = min(x0 + 1, in_size - 1)
        lam = src - x0
        m[i, x0] += 1.0 - lam
        m[i, x1] += lam
    return m


def _pad_to(n, mult):
    return ((n + mult - 1) // mult) * mult


@functools.lru_cache(maxsize=None)
def _fused_spatial_matrices(h, w, sizes):
    """P_cat (H*W, Sp): pooled = x_flat @ P_cat.  U_stack (Sp, H*W): up = y @ U_stack.

    Sp = sum(s*s) zero-padded up to a multiple of 128 (lane alignment)."""
    p_blocks, u_blocks = [], []
    for s in sizes:
        ph = adaptive_avg_pool_matrix(s, h)      # (s, H)
        pw = adaptive_avg_pool_matrix(s, w)      # (s, W)
        uh = bilinear_upsample_matrix(h, s)      # (H, s)
        uw = bilinear_upsample_matrix(w, s)      # (W, s)
        p_blocks.append(np.kron(ph, pw).T)       # (H*W, s*s)
        u_blocks.append(np.kron(uh, uw).T)       # (s*s, H*W)
    p_cat = np.concatenate(p_blocks, axis=1).astype(np.float32)    # (H*W, S)
    u_stack = np.concatenate(u_blocks, axis=0).astype(np.float32)  # (S, H*W)

    s_total = p_cat.shape[1]
    s_pad = _pad_to(s_total, 128)
    if s_pad != s_total:
        p_cat = np.pad(p_cat, ((0, 0), (0, s_pad - s_total)))
        u_stack = np.pad(u_stack, ((0, s_pad - s_total), (0, 0)))
    return jnp.asarray(p_cat), jnp.asarray(u_stack), s_pad


@functools.lru_cache(maxsize=None)
def _level_mask(out_channels, sizes, s_pad):
    """(L*OC, Sp) block-diagonal selector: row block l keeps only level l's s*s cols.

    The padded columns (beyond sum(s*s)) stay zero, so padding never leaks into
    the upsample matmul."""
    m = np.zeros((len(sizes) * out_channels, s_pad), dtype=np.float32)
    off = 0
    for l, s in enumerate(sizes):
        m[l * out_channels:(l + 1) * out_channels, off:off + s * s] = 1.0
        off += s * s
    return jnp.asarray(m)


# ---------------------------------------------------------------------------
# Fused Pallas kernel: all 4 pyramid levels + concat, one batch element and
# one channel tile per grid step.  Grid = (N, C // Ct), channel axis is the
# conv reduction ("arbitrary"), batch is "parallel".
# ---------------------------------------------------------------------------
def _ppm_fused_kernel(x_ref, p_ref, w_ref, b_ref, m_ref, u_ref, o_ref, acc_ref):
    c = pl.program_id(1)
    n_ct = pl.num_programs(1)
    ct = x_ref.shape[1]                       # channel-tile size (static)
    lvl_oc = acc_ref.shape[0]                 # L * OC (static)
    in_channels = o_ref.shape[1] - lvl_oc     # C (static)
    f32 = jnp.float32

    x = x_ref[0]                              # (Ct, H*W)

    # --- passthrough: copy this channel tile of x into the concat output ----
    start = pl.multiple_of(c * ct, ct)
    o_ref[0, pl.ds(start, ct), :] = x.astype(o_ref.dtype)

    # --- fused adaptive-avg-pool (all levels) + 1x1 conv on the MXU ---------
    @pl.when(c == 0)
    def _():
        acc_ref[...] = jnp.zeros_like(acc_ref)

    pooled = jnp.dot(x, p_ref[...], preferred_element_type=f32)              # (Ct, Sp)
    acc_ref[...] += jnp.dot(w_ref[...], pooled, preferred_element_type=f32)  # (L*OC, Sp)

    # --- last channel tile: bias, mask cross-level terms, bilinear upsample -
    @pl.when(c == n_ct - 1)
    def _():
        y = (acc_ref[...] + b_ref[...]) * m_ref[...]                         # (L*OC, Sp)
        up = jnp.dot(y, u_ref[...], preferred_element_type=f32)              # (L*OC, H*W)
        o_ref[0, pl.ds(in_channels, lvl_oc), :] = up.astype(o_ref.dtype)


# ---------------------------------------------------------------------------
# Module wrapper
# ---------------------------------------------------------------------------
def pyramid_pooling_module(x, params, sizes=(1, 2, 3, 6), channel_tile=None):
    n, c, h, w = x.shape
    hw = h * w
    num_levels = len(sizes)
    oc = params[0][0].shape[0]
    lvl_oc = num_levels * oc
    out_channels = c + lvl_oc

    # Channel tiling bounds VMEM independent of C (matters on v7x: 64 MiB).
    # Tiles smaller than C must respect the (8, 128) block constraint, so we
    # only tile with multiples of 128 when C is large.
    if channel_tile is None:
        channel_tile = c if c <= 1024 else 512
    if c % channel_tile != 0:
        channel_tile = c
    n_ct = c // channel_tile

    p_cat, u_stack, s_pad = _fused_spatial_matrices(h, w, tuple(sizes))
    mask = _level_mask(oc, tuple(sizes), s_pad)
    w_all = jnp.concatenate([wl.reshape(oc, c) for wl, _ in params], axis=0)  # (L*OC, C)
    b_all = jnp.concatenate([bl.reshape(oc, 1) for _, bl in params], axis=0)  # (L*OC, 1)

    x_flat = x.reshape(n, c, hw)

    # Rough VMEM footprint (double-buffered pipelined operands + resident
    # output block + scratch accumulator), capped at 64 MiB so it is valid on
    # every current TPU generation.
    fp32 = 4
    est = fp32 * (
        2 * channel_tile * hw                 # x tile (double buffered)
        + 2 * hw * s_pad                      # P_cat
        + 2 * lvl_oc * channel_tile           # W_all tile
        + 2 * lvl_oc * (1 + s_pad)            # bias + mask
        + 2 * s_pad * hw                      # U_stack
        + 2 * out_channels * hw               # output block
        + lvl_oc * s_pad                      # acc scratch
    )
    vmem_limit = int(min(64 * 2**20, max(16 * 2**20, 2 * est)))

    out_flat = pl.pallas_call(
        _ppm_fused_kernel,
        out_shape=jax.ShapeDtypeStruct((n, out_channels, hw), jnp.float32),
        grid=(n, n_ct),
        in_specs=[
            pl.BlockSpec((1, channel_tile, hw), lambda i, j: (i, j, 0)),       # x
            pl.BlockSpec((hw, s_pad), lambda i, j: (0, 0)),                    # P_cat
            pl.BlockSpec((lvl_oc, channel_tile), lambda i, j: (0, j)),         # W_all
            pl.BlockSpec((lvl_oc, 1), lambda i, j: (0, 0)),                    # bias
            pl.BlockSpec((lvl_oc, s_pad), lambda i, j: (0, 0)),                # mask
            pl.BlockSpec((s_pad, hw), lambda i, j: (0, 0)),                    # U_stack
        ],
        out_specs=pl.BlockSpec((1, out_channels, hw), lambda i, j: (i, 0, 0)),
        scratch_shapes=[pltpu.VMEM((lvl_oc, s_pad), jnp.float32)],
        compiler_params=pltpu.CompilerParams(
            dimension_semantics=("parallel", "arbitrary"),
            vmem_limit_bytes=vmem_limit),
        # TODO(synk): for production PSPNet shapes (C~2048, H*W~4096) also tile
        # the H*W axis and consider bf16 inputs with f32 accumulation.
    )(x_flat, p_cat, w_all, b_all, mask, u_stack)

    return out_flat.reshape(n, out_channels, h, w)


def init_params(key, in_channels, sizes=(1, 2, 3, 6)):
    """Deterministic Conv2d(in, in//len(sizes), 1) params (PyTorch-style init)."""
    oc = in_channels // len(sizes)
    bound = 1.0 / np.sqrt(in_channels)  # fan_in = in_channels * 1 * 1
    params = []
    for i in range(len(sizes)):
        kw, kb = jax.random.split(jax.random.fold_in(key, i))
        w = jax.random.uniform(kw, (oc, in_channels, 1, 1), jnp.float32,
                               -bound, bound)
        b = jax.random.uniform(kb, (oc, 1, 1), jnp.float32, -bound, bound)
        params.append((w, b))
    return params


# ---------------------------------------------------------------------------
# Pure-numpy reference (float64) for a structural self-check
# ---------------------------------------------------------------------------
def _reference_numpy(x, params, sizes):
    x64 = x.astype(np.float64)
    _, c, h, w = x64.shape
    feats = [x64]
    for s, (wl, bl) in zip(sizes, params):
        ph = adaptive_avg_pool_matrix(s, h).astype(np.float64)
        pw = adaptive_avg_pool_matrix(s, w).astype(np.float64)
        uh = bilinear_upsample_matrix(h, s).astype(np.float64)
        uw = bilinear_upsample_matrix(w, s).astype(np.float64)
        w2 = wl.astype(np.float64).reshape(wl.shape[0], c)
        b2 = bl.astype(np.float64).reshape(wl.shape[0], 1, 1)
        pooled = np.einsum('nchw,ih,jw->ncij', x64, ph, pw)
        y = np.einsum('oc,ncij->noij', w2, pooled) + b2
        up = np.einsum('noij,hi,wj->nohw', y, uh, uw)
        feats.append(up)
    return np.concatenate(feats, axis=1).astype(np.float32)


if __name__ == "__main__":
    key = jax.random.PRNGKey(0)
    N, C, H, W = 2, 8, 16, 16
    sizes = (1, 2, 3, 6)

    x = jax.random.normal(jax.random.fold_in(key, 1000), (N, C, H, W),
                          dtype=jnp.float32)
    params = init_params(key, C, sizes)

    out = pyramid_pooling_module(x, params, sizes)
    out = jax.block_until_ready(out)

    expected_channels = C + len(sizes) * (C // len(sizes))   # 8 + 4*2 = 16
    assert out.shape == (N, expected_channels, H, W), out.shape
    assert bool(jnp.all(jnp.isfinite(out)))

    ref = _reference_numpy(np.asarray(x),
                           [(np.asarray(wl), np.asarray(bl)) for wl, bl in params],
                           sizes)
    max_err = float(np.max(np.abs(np.asarray(out) - ref)))
    assert max_err < 2e-2, f"max abs error vs reference too large: {max_err}"

    print("KERNEL_OK")
</pallas_src>

<mosaic_0001>
module attributes {stable_mosaic.version = 11 : i64} {
  func.func @_ppm_fused_kernel(%arg0: i32, %arg1: i32, %arg2: memref<1x8x256xf32, #tpu.memory_space<vmem>>, %arg3: memref<256x128xf32, #tpu.memory_space<vmem>>, %arg4: memref<8x8xf32, #tpu.memory_space<vmem>>, %arg5: memref<8x1xf32, #tpu.memory_space<vmem>>, %arg6: memref<8x128xf32, #tpu.memory_space<vmem>>, %arg7: memref<128x256xf32, #tpu.memory_space<vmem>>, %arg8: memref<1x16x256xf32, #tpu.memory_space<vmem>>, %arg9: memref<8x128xf32, #tpu.memory_space<vmem>>) attributes {dimension_semantics = [#tpu.dimension_semantics<parallel>, #tpu.dimension_semantics<arbitrary>], iteration_bounds = array<i64: 2, 1>, scalar_prefetch = 0 : i64, scratch_operands = 1 : i64, tpu.core_type = #tpu.core_type<tc>, window_params = [{transform_indices = @transform_0, window_bounds = array<i64: 1, 8, 256>}, {pipeline_mode = #tpu.pipeline_mode<synchronous>, transform_indices = @transform_1, window_bounds = array<i64: 256, 128>}, {transform_indices = @transform_2, window_bounds = array<i64: 8, 8>}, {pipeline_mode = #tpu.pipeline_mode<synchronous>, transform_indices = @transform_3, window_bounds = array<i64: 8, 1>}, {pipeline_mode = #tpu.pipeline_mode<synchronous>, transform_indices = @transform_4, window_bounds = array<i64: 8, 128>}, {pipeline_mode = #tpu.pipeline_mode<synchronous>, transform_indices = @transform_5, window_bounds = array<i64: 128, 256>}, {transform_indices = @transform_6, window_bounds = array<i64: 1, 16, 256>}]} {
    %c0 = arith.constant 0 : index
    %c0_0 = arith.constant 0 : index
    %c0_1 = arith.constant 0 : index
    %0 = vector.load %arg2[%c0, %c0_0, %c0_1] : memref<1x8x256xf32, #tpu.memory_space<vmem>>, vector<1x8x256xf32>
    %1 = vector.shape_cast %0 : vector<1x8x256xf32> to vector<8x256xf32>
    %c8_i32 = arith.constant 8 : i32
    %2 = arith.muli %arg1, %c8_i32 : i32
    %3 = tpu.assume_multiple %2, 8 : i32
    %c0_2 = arith.constant 0 : index
    %4 = arith.index_cast %3 : i32 to index
    %c0_3 = arith.constant 0 : index
    %5 = vector.load %arg8[%c0_2, %4, %c0_3] : memref<1x16x256xf32, #tpu.memory_space<vmem>>, vector<1x8x256xf32>
    %6 = vector.shape_cast %5 : vector<1x8x256xf32> to vector<8x256xf32>
    %7 = vector.shape_cast %1 : vector<8x256xf32> to vector<1x8x256xf32>
    tpu.vector_store %arg8[%c0_2, %4, %c0_3], %7 {strides = array<i32>} : memref<1x16x256xf32, #tpu.memory_space<vmem>>, vector<1x8x256xf32>,
    %c0_i32 = arith.constant 0 : i32
    %8 = arith.cmpi eq, %arg1, %c0_i32 : i32
    %9 = arith.extui %8 : i1 to i32
    %c0_i32_4 = arith.constant 0 : i32
    %10 = arith.cmpi ne, %9, %c0_i32_4 : i32
    scf.if %10 {
      %cst_16 = arith.constant 0.000000e+00 : f32
      %21 = vector.broadcast %cst_16 : f32 to vector<8x128xf32>
      %c0_17 = arith.constant 0 : index
      %c0_18 = arith.constant 0 : index
      %22 = vector.load %arg9[%c0_17, %c0_18] : memref<8x128xf32, #tpu.memory_space<vmem>>, vector<8x128xf32>
      tpu.vector_store %arg9[%c0_17, %c0_18], %21 {strides = array<i32>} : memref<8x128xf32, #tpu.memory_space<vmem>>, vector<8x128xf32>,
    } else {
    }
    %c0_5 = arith.constant 0 : index
    %c0_6 = arith.constant 0 : index
    %11 = vector.load %arg3[%c0_5, %c0_6] : memref<256x128xf32, #tpu.memory_space<vmem>>, vector<256x128xf32>
    %cst = arith.constant dense<0.000000e+00> : vector<8x128xf32>
    %12 = tpu.matmul %1, %11, %cst {dimension_numbers = #tpu.dot_dimension_numbers<[1], [0], [0], [1], [0, 0, 1, 1], [], []>} : vector<8x256xf32>, vector<256x128xf32>, vector<8x128xf32> -> vector<8x128xf32>
    %c0_7 = arith.constant 0 : index
    %c0_8 = arith.constant 0 : index
    %13 = vector.load %arg9[%c0_7, %c0_8] : memref<8x128xf32, #tpu.memory_space<vmem>>, vector<8x128xf32>
    %c0_9 = arith.constant 0 : index
    %c0_10 = arith.constant 0 : index
    %14 = vector.load %arg4[%c0_9, %c0_10] : memref<8x8xf32, #tpu.memory_space<vmem>>, vector<8x8xf32>
    %cst_11 = arith.constant dense<0.000000e+00> : vector<8x128xf32>
    %15 = tpu.matmul %14, %12, %cst_11 {dimension_numbers = #tpu.dot_dimension_numbers<[1], [0], [0], [1], [0, 0, 1, 1], [], []>} : vector<8x8xf32>, vector<8x128xf32>, vector<8x128xf32> -> vector<8x128xf32>
    %16 = arith.addf %13, %15 : vector<8x128xf32>
    %c0_12 = arith.constant 0 : index
    %c0_13 = arith.constant 0 : index
    %17 = vector.load %arg9[%c0_12, %c0_13] : memref<8x128xf32, #tpu.memory_space<vmem>>, vector<8x128xf32>
    tpu.vector_store %arg9[%c0_12, %c0_13], %16 {strides = array<i32>} : memref<8x128xf32, #tpu.memory_space<vmem>>, vector<8x128xf32>,
    %c0_i32_14 = arith.constant 0 : i32
    %18 = arith.cmpi eq, %arg1, %c0_i32_14 : i32
    %19 = arith.extui %18 : i1 to i32
    %c0_i32_15 = arith.constant 0 : i32
    %20 = arith.cmpi ne, %19, %c0_i32_15 : i32
    scf.if %20 {
      %c0_16 = arith.constant 0 : index
      %c0_17 = arith.constant 0 : index
      %21 = vector.load %arg9[%c0_16, %c0_17] : memref<8x128xf32, #tpu.memory_space<vmem>>, vector<8x128xf32>
      %c0_18 = arith.constant 0 : index
      %c0_19 = arith.constant 0 : index
      %22 = vector.load %arg5[%c0_18, %c0_19] : memref<8x1xf32, #tpu.memory_space<vmem>>, vector<8x1xf32>
      %23 = vector.broadcast %22 : vector<8x1xf32> to vector<8x128xf32>
      %24 = arith.addf %21, %23 : vector<8x128xf32>
      %c0_20 = arith.constant 0 : index
      %c0_21 = arith.constant 0 : index
      %25 = vector.load %arg6[%c0_20, %c0_21] : memref<8x128xf32, #tpu.memory_space<vmem>>, vector<8x128xf32>
      %26 = arith.mulf %24, %25 : vector<8x128xf32>
      %c0_22 = arith.constant 0 : index
      %c0_23 = arith.constant 0 : index
      %27 = vector.load %arg7[%c0_22, %c0_23] : memref<128x256xf32, #tpu.memory_space<vmem>>, vector<128x256xf32>
      %cst_24 = arith.constant dense<0.000000e+00> : vector<8x256xf32>
      %28 = tpu.matmul %26, %27, %cst_24 {dimension_numbers = #tpu.dot_dimension_numbers<[1], [0], [0], [1], [0, 0, 1, 1], [], []>} : vector<8x128xf32>, vector<128x256xf32>, vector<8x256xf32> -> vector<8x256xf32>
      %c0_25 = arith.constant 0 : index
      %c8 = arith.constant 8 : index
      %c0_26 = arith.constant 0 : index
      %29 = vector.load %arg8[%c0_25, %c8, %c0_26] : memref<1x16x256xf32, #tpu.memory_space<vmem>>, vector<1x8x256xf32>
      %30 = vector.shape_cast %29 : vector<1x8x256xf32> to vector<8x256xf32>
      %31 = vector.shape_cast %28 : vector<8x256xf32> to vector<1x8x256xf32>
      tpu.vector_store %arg8[%c0_25, %c8, %c0_26], %31 {strides = array<i32>} : memref<1x16x256xf32, #tpu.memory_space<vmem>>, vector<1x8x256xf32>,
    } else {
    }
    return
  }
  func.func @transform_0(%arg0: i32, %arg1: i32) -> (i32, i32, i32) {
    %c0_i32 = arith.constant 0 : i32
    %c0_i32_0 = arith.constant 0 : i32
    return %arg0, %arg1, %c0_i32 : i32, i32, i32
  }
  func.func @transform_1(%arg0: i32, %arg1: i32) -> (i32, i32) {
    %c0_i32 = arith.constant 0 : i32
    %c0_i32_0 = arith.constant 0 : i32
    %c0_i32_1 = arith.constant 0 : i32
    return %c0_i32, %c0_i32_0 : i32, i32
  }
  func.func @transform_2(%arg0: i32, %arg1: i32) -> (i32, i32) {
    %c0_i32 = arith.constant 0 : i32
    %c0_i32_0 = arith.constant 0 : i32
    return %c0_i32, %arg1 : i32, i32
  }
  func.func @transform_3(%arg0: i32, %arg1: i32) -> (i32, i32) {
    %c0_i32 = arith.constant 0 : i32
    %c0_i32_0 = arith.constant 0 : i32
    %c0_i32_1 = arith.constant 0 : i32
    return %c0_i32, %c0_i32_0 : i32, i32
  }
  func.func @transform_4(%arg0: i32, %arg1: i32) -> (i32, i32) {
    %c0_i32 = arith.constant 0 : i32
    %c0_i32_0 = arith.constant 0 : i32
    %c0_i32_1 = arith.constant 0 : i32
    return %c0_i32, %c0_i32_0 : i32, i32
  }
  func.func @transform_5(%arg0: i32, %arg1: i32) -> (i32, i32) {
    %c0_i32 = arith.constant 0 : i32
    %c0_i32_0 = arith.constant 0 : i32
    %c0_i32_1 = arith.constant 0 : i32
    return %c0_i32, %c0_i32_0 : i32, i32
  }
  func.func @transform_6(%arg0: i32, %arg1: i32) -> (i32, i32, i32) {
    %c0_i32 = arith.constant 0 : i32
    %c0_i32_0 = arith.constant 0 : i32
    %c0_i32_1 = arith.constant 0 : i32
    return %arg0, %c0_i32, %c0_i32_0 : i32, i32, i32
  }
}

</mosaic_0001>

<bundles_post_ra>
// kernel: tpu_custom_call.1
= control target key start
LH: loop header
LB: loop body
LE: loop exit
PB: predicated region body
PF: predicated region fallthrough
CT: control target
= control target key end

     0   :  { %s1358_s0 = inlined_call_operand.hbm [shape: f32[2,8,256], index: 0, kind: input, shape index: {}]   ;;  %s1359_s1 = inlined_call_operand.hbm [shape: f32[256,128], index: 1, kind: input, shape index: {}]   ;;  %s1360_s2 = inlined_call_operand.vmem [shape: f32[8,8], index: 2, kind: input, shape index: {}]   ;;  %s1361_s3 = inlined_call_operand.vmem [shape: f32[8,1], index: 3, kind: input, shape index: {}]   ;;  %s1362_s4 = inlined_call_operand.vmem [shape: f32[8,128], index: 4, kind: input, shape index: {}]   ;;  %s1363_s5 = inlined_call_operand.hbm [shape: f32[128,256], index: 5, kind: input, shape index: {}]   ;;  %s1364_s6 = inlined_call_operand.hbm [shape: f32[2,16,256], index: 6, kind: output, shape index: {}]  }
   0x1   :  { %1368 = sst [smem:[#allocation13_spill]] %s1359_s1 }
   0x2   :  { %1369 = sst [smem:[#allocation14_spill]] %s1363_s5 }
   0x3   :  { %11 = vsyncpa [#allocation4], 0 }
   0x4   :  { %13 = vsyncpa [#allocation4 + $0x1], 0 }
   0x5   :  { %14 = vsyncpa [#allocation7], 0 }
   0x6   :  { %15 = vsyncpa [#allocation5], 0 }
   0x7   :  { %17 = vsyncpa [#allocation5 + $0x1], 0  ;;  %s1149_s21 = smov 0   ;;  %s1151_s22 = smov 0  }
   0x8   :  { %s1153_s23 = smov 0   ;;  %s1155_s24 = smov 0  }
   0x9   :  { %s1157_s25 = smov 0   ;;  %s1159_s26 = smov 0  }
   0xa LB: > { %s777_s27 = sadd.s32 4294967295, %s1099_s26   ;;  %s778_s28 = sadd.s32 4294967294, %s1099_s26   ;;  %s1099_s26 = sphi %s1159_s26, %s23_s26   ;;  %s1095_s25 = sphi %s1157_s25, %s1388_s25   ;;  %s1091_s24 = sphi %s1155_s24, %s1387_s24   ;;  %s1087_s23 = sphi %s1153_s23, %s1386_s23   ;;  %s1083_s22 = sphi %s1151_s22, %s1385_s22   ;;  %s1079_s21 = sphi %s1149_s21, %s1384_s21  }
   0xb   : > { %p57_p0 = scmp.ne.s32.totalorder %s1083_s22, %s1079_s21  ;;  %p1183_p1 = scmp.eq.s32.totalorder %s777_s27, 0 }
   0xc   : > { %p1187_p2 = scmp.eq.s32.totalorder %s777_s27, 1  ;;  %p197_p3 = scmp.eq.s32.totalorder %s778_s28, 1 }
   0xd   : > { %s1370_s29 = scalar_select %p1183_p1, 1, 0 }
   0xe   : > { %p1193_p4 = por %p1183_p1, %p57_p0  ;;  %p779_p5 = scmp.ge.s32.totalorder %s1099_s26, 1 }
   0xf   : > { %p1198_p6 = por %p197_p3, %p57_p0  ;;  %p204_p7 = scmp.lt.s32.totalorder %s1099_s26, 3 }
  0x10   : > { %s1372_s7 = scalar_select %p1193_p4, 1, 0 }
  0x11   : > { %s1373_s8 = scalar_select %p1198_p6, 1, 0 }
  0x12   : > { %p1203_p8 = pnand %p779_p5, %p204_p7  ;;  %s1101_s10 = smov [#allocation6]  }
  0x13   : > { %s216_s11 = sshll.u32 %s1101_s10, 4  ;;  %s1102_s13 = smov [#allocation8]   ;;  %s217_s11 = int_to_ptr.vmem [resolvable:$true] %s216_s11 }
  0x14   : > { %p854_p9 = pneg %p1203_p8  ;;  %s242_s14 = sshll.u32 %s1102_s13, 4  ;;  %s243_s14 = int_to_ptr.vmem [resolvable:$true] %s242_s14 }
  0x15   : > { %s946_s15 = scalar_lea.vmem %s217_s11, 4096  ;;  %p954_p5 = scmp.lt.s32.totalorder %s217_s11, %s217_s11 }
  0x16   : > { %p1212_p11 = pnand %p854_p9, %p1183_p1  ;;  %p947_p13 = scmp.ne.s32.totalorder %s217_s11, %s946_s15 }
  0x17   : > { %p955_p7 = scmp.lt.s32.totalorder %s946_s15, %s946_s15 }
  0x18   : > { %p937_p12 = pneg %p1212_p11 }
  0x19   : > { %p956_p10 = por %p955_p7, %p954_p5 }
  0x1a   : > { %p949_p0 = pnand %p947_p13, %p937_p12 }
  0x1c   : > { %p950_p3 = pneg %p949_p0 }
  0x1e   : > { %p957_p9 = pnand %p956_p10, %p950_p3 }
  0x20   : > { %960 = shalt.err (!%p957_p9)
}
  0x21   : > { %s1103_s16 = smov 128   ;;  %s1104_s17 = smov 8  }
  0x22   : > { %s1376_s1 = sld [smem:[#allocation13_spill]]  ;;  %s972_s20 = scalar_lea.vmem %s243_s14, 4096 }
  0x23   : > { %p973_p6 = scmp.ne.s32.totalorder %s243_s14, %s972_s20  ;;  %p980_p1 = scmp.lt.s32.totalorder %s243_s14, %s243_s14 }
  0x24   : > { %p981_p4 = scmp.lt.s32.totalorder %s972_s20, %s972_s20 }
  0x25   : > { %p975_p13 = pnand %p973_p6, %p937_p12 }
  0x26   : > { %p982_p5 = por %p981_p4, %p980_p1 }
  0x27   : > { %p976_p0 = pneg %p975_p13 }
  0x28   : > { %857 = dma.hbm_to_vmem [thread:$0]  (!%p1212_p11), %s1376_s1, 4096, %s217_s11, [#allocation7], %s1103_s16, %s1103_s16, %s1104_s17  }
  0x29   : > { %p983_p10 = pnand %p982_p5, %p976_p0 }
  0x2b   : > { %986 = shalt.err (!%p983_p10)
}
  0x2c   : > { %s1105_s27 = smov 256   ;;  %s1106_s28 = smov 16  }
  0x2d   : > { %s1377_s5 = sld [smem:[#allocation14_spill]]  ;;  %s35_s13 = sadd.s32 1, %s1095_s25 }
  0x2e   : > { %s44_s15 = sadd.s32 1, %s1087_s23  ;;  %p37_p1 = scmp.ge.s32.totalorder %s35_s13, 2 }
  0x2f   : > { %p51_p4 = scmp.ne.s32.totalorder %s1087_s23, %s1083_s22  ;;  %p52_p6 = scmp.eq.s32.totalorder %s1099_s26, 0 }
  0x30   : > { %p871_p12 = scmp.lt.s32.totalorder %s1099_s26, 2  ;;  %s1390_s13 = smov (%p37_p1, %s35_s13), 0 }
  0x31   : > { %p53_p3 = por %p52_p6, %p51_p4  ;;  %p1244_p7 = por %p1187_p2, %p51_p4 }
  0x32   : > { %s39_s12 = ssub.s32 %s1095_s25, %s1390_s13  ;;  %s256_s17 = sand.u32 1, %s1087_s23  }
  0x33   : > { %860 = dma.hbm_to_vmem [thread:$0]  (!%p1212_p11), %s1377_s5, 4096, %s243_s14, [#allocation7], %s1105_s27, %s1105_s27, %s1106_s28  }
  0x34   : > { %p42_p9 = scmp.eq.s32.totalorder %s39_s12, 0  ;;  %s784_s14 = sshll.u32 %s256_s17, 4 }
  0x35   : > { %s798_s18 = sshll.u32 %s1095_s25, 8  ;;  %s260_s10 = scalar_lea.vmem [#allocation3], %s784_s14 }
  0x36   : > { %s1253_s19 = scalar_select %p42_p9, %s1087_s23, %s44_s15  }
  0x37   : > { %s268_s28 = scalar_lea.hbm %s1358_s0, %s798_s18  ;;  %s270_s11 = sshll.u32 %s260_s10, 4  ;;  %s271_s11 = int_to_ptr.vmem [resolvable:$true] %s270_s11 }
  0x38   : > { %p1260_p11 = pnand %p871_p12, %p53_p3  ;;  %s257_s1 = scalar_lea.sflag [#allocation4], %s256_s17 }
  0x39   : > { %s1000_s12 = scalar_lea.vmem %s271_s11, 256  ;;  %s1107_s15 = smov [#allocation3]  }
  0x3a   : > { %p989_p2 = pneg %p1260_p11  ;;  %p1001_p13 = scmp.ne.s32.totalorder %s271_s11, %s1000_s12 }
  0x3b   : > { %s1005_s5 = sshll.u32 %s1107_s15, 4  ;;  %s1006_s5 = int_to_ptr.vmem [resolvable:$false] %s1005_s5 }
  0x3c   : > { %p1003_p0 = pnand %p1001_p13, %p989_p2  ;;  %s1007_s18 = scalar_lea.vmem %s1006_s5, 512 }
  0x3d   : > { %p1008_p10 = scmp.lt.s32.totalorder %s271_s11, %s1006_s5  ;;  %p1009_p1 = scmp.lt.s32.totalorder %s1007_s18, %s1000_s12 }
  0x3e   : > { %p1004_p5 = pneg %p1003_p0 }
  0x3f   : > { %p1010_p4 = por %p1009_p1, %p1008_p10 }
  0x41   : > { %p1011_p6 = pnand %p1010_p4, %p1004_p5 }
  0x43   : > { %1014 = shalt.err (!%p1011_p6)
}
  0x44   : > { %864 = dma.hbm_to_vmem [thread:$0]  (!%p1260_p11), %s268_s28, 256, %s271_s11, %s257_s1  }
  0x45   : > { %279 = sbr.rel (%p1203_p8) target bundleno = 715 (0x2cb), region = 44  ;;  %s1271_s17 = sand.u32 (!%p1203_p8), 1, %s1083_s22  }
  0x46   : > { %s788_s14 = sshll.u32 (!%p1203_p8), %s1271_s17, 4  ;;  %s282_s20 = scalar_lea.sflag (!%p1203_p8), [#allocation4], %s1271_s17 }
  0x47   : > { %s1275_s27 = scalar_lea.vmem (!%p1203_p8), [#allocation3], %s788_s14  ;;  %p1380_p12 = scmp.ne.s32.totalorder (!%p1203_p8), %s1372_s7, 0 }
  0x4a   : > { %1066 = dma.done.wait (%p1380_p12), %s282_s20, 256  }
  0x4b   : > { %1068 = vsyncadd (%p1380_p12), %s282_s20, 4294967040  ;;  %p1381_p3 = scmp.ne.s32.totalorder %s1370_s29, 0 }
  0x4d   : > { %1070 = dma.done.wait (%p1381_p3), [#allocation7], 8192  }
  0x4e   : > { %1072 = vsyncadd (%p1381_p3), [#allocation7], 4294959104  ;;  %v376_v0 = vld [vmem:[#allocation6 + $0xf8] sm:$0xff]  ;;  %v375_v2 = vld [vmem:[#allocation6 + $0xf0] sm:$0xff]  ;;  %s791_s1 = sshll.u32 %s1271_s17, 5  ;;  %v1108_v34 = vmov 0.0  }
  0x4f   : > { %v360_v1 = vld [vmem:[#allocation6 + $0x78] sm:$0xff]  ;;  %800 = vmatprep.subr.mxu0 %v376_v0  ;;  %v359_v3 = vld [vmem:[#allocation6 + $0x70] sm:$0xff]  ;;  %v374_v4 = vld [vmem:[#allocation6 + $0xe8] sm:$0xff]  ;;  %s1287_s5 = scalar_lea.vmem [#allocation9], %s791_s1  ;;  %837 = vmatprep.subr.mxu1 %v1108_v34  ;;  %vm1109_vm0 = vmmov 0   ;;  %v1110_v36 = vmov 0  }
  0x50   : > { %801 = vmatpush3.msra.mxu0 %v360_v1  ;;  %v358_v5 = vld [vmem:[#allocation6 + $0x68] sm:$0xff]  ;;  %v373_v6 = vld [vmem:[#allocation6 + $0xe0] sm:$0xff]  ;;  %v372_v8 = vld [vmem:[#allocation6 + $0xd8] sm:$0xff]  ;;  %839 = vmatprep.mubr.msk.f32.mxu1 %vm1109_vm0, %v1108_v34  ;;  %vm449_vm1 = vcmask 64512   ;;  %s657_s30 = sshll.u32 %s1287_s5, 4  ;;  %s799_s12 = sshll.u32 %s1091_s24, 9  ;;  %s1303_s30 = int_to_ptr.vmem [resolvable:$true] %s657_s30 }
  0x51   : > { %802 = vmatprep.subr.mxu0 %v375_v2  ;;  %v357_v7 = vld [vmem:[#allocation6 + $0x60] sm:$0xff]  ;;  %v356_v9 = vld [vmem:[#allocation6 + $0x58] sm:$0xff]  ;;  %v371_v10 = vld [vmem:[#allocation6 + $0xd0] sm:$0xff]  ;;  %934 = vset.pattern.permute.xlu0 %v1110_v36  ;;  %s1308_s14 = scalar_lea.hbm %s1364_s6, %s799_s12  ;;  %s644_s20 = scalar_lea.sflag [#allocation5], %s1271_s17 }
  0x52   : > { %803 = vmatpush3.msra.mxu0 %v359_v3  ;;  %v355_v11 = vld [vmem:[#allocation6 + $0x50] sm:$0xff]  ;;  %v370_v12 = vld [vmem:[#allocation6 + $0xc8] sm:$0xff]  ;;  %v369_v16 = vld [vmem:[#allocation6 + $0xc0] sm:$0xff]  ;;  %s1111_s24 = smov [#allocation9]  }
  0x53   : > { %804 = vmatprep.subr.mxu0 %v374_v4  ;;  %v331_v13 = vld [vmem:[%s1275_s27 + $0x8] sm:$0xff]  ;;  %v330_v15 = vld [vmem:[%s1275_s27] sm:$0xff]  ;;  %s1015_s27 = scalar_lea.vmem %s1303_s30, 512  ;;  %s1019_s1 = sshll.u32 %s1111_s24, 4  ;;  %s1020_s1 = int_to_ptr.vmem [resolvable:$false] %s1019_s1 }
  0x54   : > { %805 = vmatpush3.msra.mxu0 %v358_v5  ;;  %v354_v14 = vld [vmem:[#allocation6 + $0x48] sm:$0xff]  ;;  %339 = vst [vmem:[%s1287_s5 + $0x8] sm:$0xff] %v331_v13  ;;  %441 = vmatprep.mubr.f32.mxu0 %v331_v13  ;;  %338 = vst [vmem:[%s1287_s5] sm:$0xff] %v330_v15  ;;  %v353_v17 = vld [vmem:[#allocation6 + $0x40] sm:$0xff]  ;;  %p1016_p8 = scmp.ne.s32.totalorder %s1303_s30, %s1015_s27  ;;  %s1021_s29 = scalar_lea.vmem %s1020_s1, 1024 }
  0x55   : > { %806 = vmatprep.subr.mxu0 %v373_v6  ;;  %v368_v18 = vld [vmem:[#allocation6 + $0xb8] sm:$0xff]  ;;  %v367_v20 = vld [vmem:[#allocation6 + $0xb0] sm:$0xff]  ;;  %v366_v22 = vld [vmem:[#allocation6 + $0xa8] sm:$0xff]  ;;  %p1022_p2 = scmp.lt.s32.totalorder %s1303_s30, %s1020_s1  ;;  %p1023_p13 = scmp.lt.s32.totalorder %s1021_s29, %s1015_s27 }
  0x56   : > { %807 = vmatpush3.msra.mxu0 %v357_v7  ;;  %v352_v19 = vld [vmem:[#allocation6 + $0x38] sm:$0xff]  ;;  %v351_v21 = vld [vmem:[#allocation6 + $0x30] sm:$0xff]  ;;  %v350_v23 = vld [vmem:[#allocation6 + $0x28] sm:$0xff]  ;;  %p1017_p9 = pnand %p1016_p8, %p1244_p7 }
  0x57   : > { %808 = vmatprep.subr.mxu0 %v372_v8  ;;  %v365_v24 = vld [vmem:[#allocation6 + $0xa0] sm:$0xff]  ;;  %v364_v26 = vld [vmem:[#allocation6 + $0x98] sm:$0xff]  ;;  %v363_v28 = vld [vmem:[#allocation6 + $0x90] sm:$0xff]  ;;  %p1024_p0 = por %p1023_p13, %p1022_p2 }
  0x58   : > { %809 = vmatpush3.msra.mxu0 %v356_v9  ;;  %v349_v25 = vld [vmem:[#allocation6 + $0x20] sm:$0xff]  ;;  %v348_v27 = vld [vmem:[#allocation6 + $0x18] sm:$0xff]  ;;  %v347_v29 = vld [vmem:[#allocation6 + $0x10] sm:$0xff]  ;;  %p1018_p11 = pneg %p1017_p9 }
  0x59   : > { %810 = vmatprep.subr.mxu0 %v371_v10  ;;  %v362_v30 = vld [vmem:[#allocation6 + $0x88] sm:$0xff]  ;;  %v361_v32 = vld [vmem:[#allocation6 + $0x80] sm:$0xff]  ;;  %v569_v41 = vld [vmem:[#allocation8 + $0xf8] sm:$0xff] }
  0x5a   : > { %811 = vmatpush3.msra.mxu0 %v355_v11  ;;  %v346_v31 = vld [vmem:[#allocation6 + $0x8] sm:$0xff]  ;;  %v345_v33 = vld [vmem:[#allocation6] sm:$0xff]  ;;  %v568_v42 = vld [vmem:[#allocation8 + $0xf0] sm:$0xff]  ;;  %p1025_p5 = pnand %p1024_p0, %p1018_p11 }
  0x5b   : > { %812 = vmatprep.subr.mxu0 %v370_v12  ;;  %v529_v35 = vld [vmem:[%s1361_s3] sm:$0xff]  ;;  %v567_v43 = vld [vmem:[#allocation8 + $0xe8] sm:$0xff]  ;;  %v565_v45 = vld [vmem:[#allocation8 + $0xd8] sm:$0xff] }
  0x5c   : > { %813 = vmatpush3.msra.mxu0 %v354_v14  ;;  %532 = vperm.xlu0 %934, %v529_v35   ;;  %v448_v40 = vld [vmem:[%s1360_s2] sm:$0xff]  ;;  %v564_v46 = vld [vmem:[#allocation8 + $0xd0] sm:$0xff]  ;;  %v563_v47 = vld [vmem:[#allocation8 + $0xc8] sm:$0xff] }
  0x5d   : > { %814 = vmatprep.subr.mxu0 %v369_v16  ;;  %v566_v44 = vld [vmem:[#allocation8 + $0xe0] sm:$0xff]  ;;  %v561_v49 = vld [vmem:[#allocation8 + $0xb8] sm:$0xff]  ;;  %v560_v50 = vld [vmem:[#allocation8 + $0xb0] sm:$0xff] }
  0x5e   : > { %815 = vmatpush3.msra.mxu0 %v353_v17  ;;  %v562_v48 = vld [vmem:[#allocation8 + $0xc0] sm:$0xff]  ;;  %v559_v51 = vld [vmem:[#allocation8 + $0xa8] sm:$0xff]  ;;  %v557_v53 = vld [vmem:[#allocation8 + $0x98] sm:$0xff] }
  0x5f   : > { %816 = vmatprep.subr.mxu0 %v368_v18  ;;  %v558_v52 = vld [vmem:[#allocation8 + $0xa0] sm:$0xff]  ;;  %v556_v54 = vld [vmem:[#allocation8 + $0x90] sm:$0xff]  ;;  %v555_v55 = vld [vmem:[#allocation8 + $0x88] sm:$0xff] }
  0x60   : > { %817 = vmatpush3.msra.mxu0 %v352_v19  ;;  %v554_v56 = vld [vmem:[#allocation8 + $0x80] sm:$0xff]  ;;  %v553_v57 = vld [vmem:[#allocation8 + $0x78] sm:$0xff]  ;;  %v552_v58 = vld [vmem:[#allocation8 + $0x70] sm:$0xff] }
  0x61   : > { %818 = vmatprep.subr.mxu0 %v367_v20  ;;  %v551_v59 = vld [vmem:[#allocation8 + $0x68] sm:$0xff]  ;;  %v550_v60 = vld [vmem:[#allocation8 + $0x60] sm:$0xff]  ;;  %v549_v61 = vld [vmem:[#allocation8 + $0x58] sm:$0xff] }
  0x62   : > { %819 = vmatpush3.msra.mxu0 %v351_v21  ;;  %v548_v62 = vld [vmem:[#allocation8 + $0x50] sm:$0xff]  ;;  %v547_v63 = vld [vmem:[#allocation8 + $0x48] sm:$0xff]  ;;  %v546_v0 = vld [vmem:[#allocation8 + $0x40] sm:$0xff] }
  0x63   : > { %820 = vmatprep.subr.mxu0 %v366_v22  ;;  %v545_v1 = vld [vmem:[#allocation8 + $0x38] sm:$0xff]  ;;  %v544_v2 = vld [vmem:[#allocation8 + $0x30] sm:$0xff]  ;;  %v543_v3 = vld [vmem:[#allocation8 + $0x28] sm:$0xff] }
  0x64   : > { %821 = vmatpush3.msra.mxu0 %v350_v23  ;;  %v542_v4 = vld [vmem:[#allocation8 + $0x20] sm:$0xff]  ;;  %v541_v5 = vld [vmem:[#allocation8 + $0x18] sm:$0xff]  ;;  %v540_v6 = vld [vmem:[#allocation8 + $0x10] sm:$0xff] }
  0x65   : > { %822 = vmatprep.subr.mxu0 %v365_v24  ;;  %v539_v7 = vld [vmem:[#allocation8 + $0x8] sm:$0xff]  ;;  %v538_v8 = vld [vmem:[#allocation8] sm:$0xff] }
  0x66   : > { %823 = vmatpush3.msra.mxu0 %v349_v25  ;;  %v536_v11 = vld [vmem:[%s1362_s4] sm:$0xff] }
  0x67   : > { %824 = vmatprep.subr.mxu0 %v364_v26 }
  0x68   : > { %825 = vmatpush3.msra.mxu0 %v348_v27 }
  0x69   : > { %826 = vmatprep.subr.mxu0 %v363_v28 }
  0x6a   : > { %827 = vmatpush3.msra.mxu0 %v347_v29 }
  0x6b   : > { %828 = vmatprep.subr.mxu0 %v362_v30 }
  0x6c   : > { %829 = vmatpush3.msra.mxu0 %v346_v31 }
  0x6d   : > { %830 = vmatprep.subr.mxu0 %v361_v32 }
  0x6e   : > { %831 = vmatpush3.msra.mxu0 %v345_v33 }
  0x6f   : > { %442 = vmatmul.mubr.f32.vlgmr.msra.gmra.mxu0 %v330_v15 }
  0xd7   : > { %v533_v9 = vpop.permute.xlu0 %532 }
 0x12f   : > { %v832_v37 = vpop.f32.mrf.mxu0 }
 0x131   : > { %v833_v38 = vpop.f32.mrf.mxu0 }
 0x132   : > { %v834_v39 = vadd.f32 %v833_v38, %v832_v37 }
 0x134   : > { %838 = vmatpush3.msra.mxu1 %v834_v39 }
 0x135   : > { %840 = vmatmul.mubr.msk.f32.vlgmr.msra.gmra.mxu1 %vm449_vm1, %v448_v40  ;;  %570 = vmatprep.subr.mxu1 %v569_v41 }
 0x136   : > { %571 = vmatpush1.msra.mxu1 %v568_v42  ;;  %634 = vmatprep.mubr.f32.mxu1 %v1108_v34 }
 0x137   : > { %572 = vmatprep.subr.mxu1 %v567_v43 }
 0x138   : > { %573 = vmatpush1.msra.mxu1 %v566_v44 }
 0x139   : > { %574 = vmatprep.subr.mxu1 %v565_v45 }
 0x13a   : > { %575 = vmatpush1.msra.mxu1 %v564_v46 }
 0x13b   : > { %576 = vmatprep.subr.mxu1 %v563_v47 }
 0x13c   : > { %577 = vmatpush1.msra.mxu1 %v562_v48 }
 0x13d   : > { %578 = vmatprep.subr.mxu1 %v561_v49 }
 0x13e   : > { %579 = vmatpush1.msra.mxu1 %v560_v50 }
 0x13f   : > { %580 = vmatprep.subr.mxu1 %v559_v51 }
 0x140   : > { %581 = vmatpush1.msra.mxu1 %v558_v52 }
 0x141   : > { %582 = vmatprep.subr.mxu1 %v557_v53 }
 0x142   : > { %583 = vmatpush1.msra.mxu1 %v556_v54 }
 0x143   : > { %584 = vmatprep.subr.mxu1 %v555_v55 }
 0x144   : > { %585 = vmatpush1.msra.mxu1 %v554_v56 }
 0x145   : > { %586 = vmatprep.subr.mxu1 %v553_v57 }
 0x146   : > { %587 = vmatpush1.msra.mxu1 %v552_v58 }
 0x147   : > { %588 = vmatprep.subr.mxu1 %v551_v59 }
 0x148   : > { %589 = vmatpush1.msra.mxu1 %v550_v60 }
 0x149   : > { %590 = vmatprep.subr.mxu1 %v549_v61 }
 0x14a   : > { %591 = vmatpush1.msra.mxu1 %v548_v62 }
 0x14b   : > { %592 = vmatprep.subr.mxu1 %v547_v63 }
 0x14c   : > { %593 = vmatpush1.msra.mxu1 %v546_v0 }
 0x14d   : > { %594 = vmatprep.subr.mxu1 %v545_v1 }
 0x14e   : > { %595 = vmatpush1.msra.mxu1 %v544_v2 }
 0x14f   : > { %596 = vmatprep.subr.mxu1 %v543_v3 }
 0x150   : > { %597 = vmatpush1.msra.mxu1 %v542_v4 }
 0x151   : > { %598 = vmatprep.subr.mxu1 %v541_v5 }
 0x152   : > { %599 = vmatpush1.msra.mxu1 %v540_v6 }
 0x153   : > { %600 = vmatprep.subr.mxu1 %v539_v7 }
 0x154   : > { %601 = vmatpush1.msra.mxu1 %v538_v8 }
 0x1f5   : > { %v519_v10 = vpop.f32.mrf.mxu1 }
 0x1f6   : > { %v535_v12 = vadd.f32 %v533_v9, %v519_v10 }
 0x1f7   : > { %v841_v13 = vpop.f32.mrf.mxu1 }
 0x1f8   : > { %v537_v14 = vmul.f32 %v536_v11, %v535_v12 }
 0x1fa   : > { %635 = vmatmul.mubr.f32.vlgmr.msra.gmra.mxu1 %v537_v14 }
 0x2ba   : > { %v636_v15 = vpop.f32.mrf.mxu1 }
 0x2bb   : > { %641 = vst [vmem:[%s1287_s5 + $0x10] sm:$0xff] %v636_v15 }
 0x2bc   : > { %v638_v16 = vpop.f32.mrf.mxu1 }
 0x2bd   : > { %642 = vst [vmem:[%s1287_s5 + $0x18] sm:$0xff] %v638_v16 }
 0x2be   : > { %1028 = shalt.err (!%p1025_p5)
}
 0x2bf   : > { %s1029_s5 = scalar_lea.hbm %s1308_s14, 512  ;;  %s1033_s28 = scalar_lea.hbm %s1364_s6, 1024 }
 0x2c0   : > { %p1030_p10 = scmp.ne.s32.totalorder %s1308_s14, %s1029_s5  ;;  %p1034_p6 = scmp.lt.s32.totalorder %s1308_s14, %s1364_s6 }
 0x2c1   : > { %p1035_p12 = scmp.lt.s32.totalorder %s1033_s28, %s1029_s5 }
 0x2c2   : > { %p1031_p1 = pnand %p1030_p10, %p1244_p7 }
 0x2c3   : > { %p1036_p3 = por %p1035_p12, %p1034_p6 }
 0x2c4   : > { %p1032_p4 = pneg %p1031_p1 }
 0x2c6   : > { %p1037_p8 = pnand %p1036_p3, %p1032_p4 }
 0x2c8   : > { %1040 = shalt.err (!%p1037_p8)
}
 0x2c9   : > { %s1112_s12 = smov 256   ;;  %s1113_s15 = smov 16  }
 0x2ca   : > { %852 = dma.vmem_to_hbm [thread:$0]  (%p1244_p7), %s1303_s30, 512, %s1308_s14, %s644_s20, %s1112_s12, %s1112_s12, %s1113_s15  }
 0x2cb PF: > { %s672_s18 = sand.u32 1, %s1079_s21   ;;  %p1382_p9 = scmp.ne.s32.totalorder %s1373_s8, 0 }
 0x2cc   : > { %p1383_p11 = scmp.ge.s32.totalorder %s1099_s26, 2  ;;  %s673_s27 = scalar_lea.sflag [#allocation5], %s672_s18 }
 0x2ce   : > { %p866_p2 = pnand %p1383_p11, %p1382_p9 }
 0x2d0   : > { %p867_p13 = pneg %p866_p2 }
 0x2d2   : > { %1074 = dma.done.wait (%p867_p13), %s673_s27, 512  }
 0x2d3   : > { %1076 = vsyncadd (%p867_p13), %s673_s27, 4294966784  ;;  %s23_s26 = sadd.s32 1, %s1099_s26   ;;  %s1384_s21 = smov %s1083_s22 }
 0x2d4   : > { %p20_p0 = scmp.ge.s32.totalorder %s23_s26, 4   ;;  %s1385_s22 = smov %s1087_s23 }
 0x2d5   : > { %s1386_s23 = smov %s1253_s19  ;;  %s1387_s24 = smov %s1095_s25 }
 0x2d6   : > { %s1388_s25 = smov %s1390_s13  ;;  %22 = sbr.rel (!%p20_p0) target bundleno = 10 (0xa), region = 109 }
 0x2db   :  { %678 = vsyncpa [#allocation4], 1 }
 0x2dc   :  { %680 = vsyncpa [#allocation4 + $0x1], 1 }
 0x2dd   :  { %681 = vsyncpa [#allocation7], 1 }
 0x2de   :  { %682 = vsyncpa [#allocation5], 1 }
 0x2df   :  { %684 = vsyncpa [#allocation5 + $0x1], 1 }

</bundles_post_ra>
